<compile_context>
chip_gen: v6e
topology: v6e:2x2x1
jax: 0.10.0
libtpu: 0.0.40
codegen_flags: <defaults>
</compile_context>

<pallas_src>
from functools import partial

import numpy as np
import jax
import jax.numpy as jnp
from jax.experimental import pallas as pl
from jax.experimental.pallas import tpu as pltpu

FEAT = 64          # feature_dim used by the heads / fusion
NHEADS = 8
HEAD_DIM = FEAT // NHEADS
KSIZE = 3          # TemporalAttention kernel size
NMOD = 3           # text / video / audio


def _combined_kernel(act_ref, wconv_ref, wbig_ref, bias_ref, out_ref):
    """Fused Combined_model forward.

    act_ref  : (B, 2*T*64 + 64)  = [vid_flat | aud_flat | tex]
    wconv_ref: (2*T*64, 2*T)       block-diag temporal-conv operator (both modalities)
    wbig_ref : (4, 192, 192)       [blkdiag head w_blk | blkdiag head w_out |
                                    blkdiag(gate_w x3) | [fc_w;fc_w;fc_w] zero-padded]
    bias_ref : (5, 192)            [b_blk | b_out | gate_b x3 | fc_b pad | conv_b pad]
    out_ref  : (B, num_classes)
    """
    f32 = jnp.float32
    C = FEAT
    T2 = wconv_ref.shape[1]          # 2 * T
    T = T2 // 2
    nc = out_ref.shape[1]

    act = act_ref[...].astype(f32)   # (B, 2*T*C + C)
    bias = bias_ref[...].astype(f32)  # (5, 192)

    # --- Temporal attention for both modalities: ONE MXU push, lane-dense (B, 2T) out.
    lin = jnp.dot(act[:, :T2 * C], wconv_ref[...],
                  preferred_element_type=f32) + bias[4:5, :T2]      # (B, 2T)

    def softmax_at_t0(z):            # softmax over time, evaluated at t == 0
        m = jnp.max(z, axis=1, keepdims=True)
        e = jnp.exp(z - m)
        return e[:, 0:1] / jnp.sum(e, axis=1, keepdims=True)        # (B, 1)

    vw0 = softmax_at_t0(lin[:, :T])      # video attention weight -> re-weights audio
    aw0 = softmax_at_t0(lin[:, T:T2])    # audio attention weight -> re-weights video

    # Cross-modal re-weighting. Downstream MultiHead on a 3-D input reshapes to
    # (B, T*64) and its zip() over 8 heads keeps only the first 64 columns, so
    # only the t=0 slice of the re-weighted features is consumed (faithful port).
    vid0 = act[:, 0:C] * (1.0 + aw0)                                # (B, 64)
    aud0 = act[:, T * C:T * C + C] * (1.0 + vw0)                    # (B, 64)
    tex = act[:, T2 * C:T2 * C + C]                                 # (B, 64)
    x = jnp.concatenate([tex, vid0, aud0], axis=1)                  # (B, 192)

    # --- Three MultiHead(64,8) blocks fused into two block-diagonal matmuls.
    h = jnp.dot(x, wbig_ref[0], preferred_element_type=f32) + bias[0:1, :]
    y = jnp.dot(h, wbig_ref[1], preferred_element_type=f32) + bias[1:2, :]  # (B, 192)

    # --- Shared Gate_Attention applied to all three modalities at once.
    # softmax over a size-1 axis is identically 1 and Dropout is inference
    # identity, so attended == sigmoid(x @ gate_w + gate_b) * x exactly.
    g = jax.nn.sigmoid(jnp.dot(y, wbig_ref[2], preferred_element_type=f32)
                       + bias[2:3, :])
    att = y * g                                                     # (B, 192)

    # --- Sum over modalities + fc_output fused: att @ [fc_w; fc_w; fc_w] + fc_b.
    out = (jnp.dot(att, wbig_ref[3], preferred_element_type=f32)[:, :nc]
           + bias[3:4, :nc])
    out_ref[...] = out.astype(out_ref.dtype)


@partial(jax.jit, static_argnames=("num_classes",))
def combined_model_forward(tex_out, vid_out, aud_out, packed, *, num_classes):
    """tex_out: (B,64), vid_out/aud_out: (B,T,64) -> (B, num_classes)."""
    B, T, C = vid_out.shape
    # Wrapper-side layout plumbing only (free reshapes + one tiny concat): present
    # the kernel with one lane-major activation slab -> 4 DMA'd inputs in total.
    act = jnp.concatenate(
        [vid_out.reshape(B, T * C), aud_out.reshape(B, T * C), tex_out], axis=1)
    # Shapes are tiny: no grid, everything resident in VMEM.  (If B grows large,
    # add a batch grid axis with dimension_semantics=("parallel",) for v7x.)
    return pl.pallas_call(
        _combined_kernel,
        out_shape=jax.ShapeDtypeStruct((B, num_classes), jnp.float32),
        in_specs=[pl.BlockSpec(memory_space=pltpu.MemorySpace.VMEM)] * 4,
        out_specs=pl.BlockSpec(memory_space=pltpu.MemorySpace.VMEM),
    )(act, packed["w_conv"], packed["w_big"], packed["bias"])


def pack_params(p, T, num_classes):
    """Fold the 22 tiny Combined_model parameters into 3 kernel slabs (init time)."""
    f32 = jnp.float32
    C = FEAT
    assert 2 * T <= NMOD * C and num_classes <= NMOD * C
    Z = jnp.zeros((C, C), f32)

    def bd3(a, b, c):                     # block-diag of three (64,64) matrices
        return jnp.concatenate([
            jnp.concatenate([a, Z, Z], axis=1),
            jnp.concatenate([Z, b, Z], axis=1),
            jnp.concatenate([Z, Z, c], axis=1)], axis=0)

    w1 = bd3(p["wt_blk"], p["wvh_blk"], p["wah_blk"])          # per-head linears
    w2 = bd3(p["wt_out"], p["wvh_out"], p["wah_out"])          # output linears
    w3 = bd3(p["gate_w"], p["gate_w"], p["gate_w"])            # shared gate
    w4 = jnp.zeros((NMOD * C, NMOD * C), f32).at[:, :num_classes].set(
        jnp.concatenate([p["fc_w"]] * NMOD, axis=0))           # modality-sum + fc
    w_big = jnp.stack([w1, w2, w3, w4], axis=0)                # (4, 192, 192)

    def conv_operator(w_conv):
        # (T*C, T) operator: lin[t] = sum_{t',c} x[t',c] * w[c, t'-t+1] (zero-pad),
        # i.e. Conv1d(C->1, k=3, pad=1) over time expressed as one matmul.
        tp = np.arange(T)[:, None]
        tt = np.arange(T)[None, :]
        k = tp - tt + 1
        valid = jnp.asarray((k >= 0) & (k < KSIZE))
        kc = jnp.asarray(np.clip(k, 0, KSIZE - 1))
        taps = jnp.where(valid[:, :, None], w_conv.T[kc], 0.0)  # (T, T, C)
        return jnp.transpose(taps, (0, 2, 1)).reshape(T * C, T)

    wv, wa = conv_operator(p["wv_conv"]), conv_operator(p["wa_conv"])
    ztc = jnp.zeros((T * C, T), f32)
    w_conv = jnp.concatenate(
        [jnp.concatenate([wv, ztc], axis=1),
         jnp.concatenate([ztc, wa], axis=1)], axis=0)          # (2*T*C, 2*T)

    def pad_row(v):
        v = jnp.reshape(v, (-1,)).astype(f32)
        return jnp.zeros((NMOD * C,), f32).at[:v.shape[0]].set(v)

    b1 = jnp.concatenate([p["bt_blk"], p["bvh_blk"], p["bah_blk"]], axis=1).reshape(-1)
    b2 = jnp.concatenate([p["bt_out"], p["bvh_out"], p["bah_out"]], axis=1).reshape(-1)
    b3 = jnp.concatenate([p["gate_b"]] * NMOD, axis=1).reshape(-1)
    conv_b = jnp.concatenate([jnp.full((T,), p["bv_conv"][0, 0]),
                              jnp.full((T,), p["ba_conv"][0, 0])])
    bias = jnp.stack([b1, b2, b3, pad_row(p["fc_b"]), pad_row(conv_b)], axis=0)

    return {"w_conv": w_conv, "w_big": w_big, "bias": bias}


def init_params(key, d_in, num_classes):
    keys = jax.random.split(key, 32)
    it = iter(keys)

    def u(shape, scale=0.25):
        return jax.random.uniform(next(it), shape, jnp.float32, -scale, scale)

    idx = np.arange(FEAT)
    blk_mask = jnp.asarray((idx[:, None] // HEAD_DIM) == (idx[None, :] // HEAD_DIM),
                           dtype=jnp.float32)
    params = {
        "wv_conv": u((FEAT, KSIZE)), "bv_conv": u((1, 1)),
        "wa_conv": u((FEAT, KSIZE)), "ba_conv": u((1, 1)),
        "wt_blk": u((FEAT, FEAT)) * blk_mask, "bt_blk": u((1, FEAT)),
        "wt_out": u((FEAT, FEAT)), "bt_out": u((1, FEAT)),
        "wvh_blk": u((FEAT, FEAT)) * blk_mask, "bvh_blk": u((1, FEAT)),
        "wvh_out": u((FEAT, FEAT)), "bvh_out": u((1, FEAT)),
        "wah_blk": u((FEAT, FEAT)) * blk_mask, "bah_blk": u((1, FEAT)),
        "wah_out": u((FEAT, FEAT)), "bah_out": u((1, FEAT)),
        "attn_w": u((FEAT, NHEADS)), "ctx": u((NHEADS, 1)),   # used by reference only
        "gate_w": u((FEAT, FEAT)), "gate_b": u((1, FEAT)),
        "fc_w": u((FEAT, num_classes)), "fc_b": u((1, num_classes)),
    }
    # Synthetic placeholder sub-models (unspecified in the reference).
    sub = {
        "wt": u((d_in, FEAT)), "bt": u((1, FEAT)),
        "wv": u((d_in, FEAT)), "bv": u((1, FEAT)),
        "wa": u((d_in, FEAT)), "ba": u((1, FEAT)),
    }
    return params, sub


def reference_forward(tex, vid, aud, p):
    """Pure-JAX mirror of the PyTorch graph (unpacked params), for verification."""
    hi = jax.lax.Precision.HIGHEST

    def temporal(x_bct, w_conv, b_conv):           # x_bct: (B, C, T), Conv1d NCW
        B, C, T = x_bct.shape
        xp = jnp.pad(x_bct, ((0, 0), (0, 0), (1, 1)))
        w = jnp.zeros((B, T), jnp.float32)
        for k in range(KSIZE):
            w = w + jnp.einsum("bct,c->bt", xp[:, :, k:k + T], w_conv[:, k], precision=hi)
        w = w + b_conv[0, 0]
        return jax.nn.softmax(w, axis=1)           # softmax over time (torch dim=2)

    vid_bct = jnp.transpose(vid, (0, 2, 1))
    aud_bct = jnp.transpose(aud, (0, 2, 1))
    vw = temporal(vid_bct, p["wv_conv"], p["bv_conv"])
    aw = temporal(aud_bct, p["wa_conv"], p["ba_conv"])
    vid_f = jnp.transpose(vid_bct * aw[:, None, :] + vid_bct, (0, 2, 1))
    aud_f = jnp.transpose(aud_bct * vw[:, None, :] + aud_bct, (0, 2, 1))

    def mh(x, wb, bb, wo, bo):
        if x.ndim == 3:                             # reshape + zip-truncation to first 64 cols
            x = x.reshape(x.shape[0], -1)[:, :FEAT]
        h = jnp.dot(x, wb, precision=hi) + bb
        return jnp.dot(h, wo, precision=hi) + bo

    t = mh(tex, p["wt_blk"], p["bt_blk"], p["wt_out"], p["bt_out"])
    v = mh(vid_f, p["wvh_blk"], p["bvh_blk"], p["wvh_out"], p["bvh_out"])
    a = mh(aud_f, p["wah_blk"], p["bah_blk"], p["wah_out"], p["bah_out"])

    def gate(x):
        s = jnp.tanh(jnp.dot(x, p["attn_w"], precision=hi))
        att = jax.nn.softmax(jnp.dot(s, p["ctx"], precision=hi), axis=1)
        g = jax.nn.sigmoid(jnp.dot(x, p["gate_w"], precision=hi) + p["gate_b"])
        return att * g * x

    comb = gate(t) + gate(v) + gate(a)
    return jnp.dot(comb, p["fc_w"], precision=hi) + p["fc_b"]


if __name__ == "__main__":
    B, T, D_IN, NUM_CLASSES = 2, 8, 32, 4
    key = jax.random.PRNGKey(0)
    k_in, k_p = jax.random.split(key)
    kx = jax.random.split(k_in, 3)
    x_text = jax.random.normal(kx[0], (B, D_IN), jnp.float32)
    x_vid = jax.random.normal(kx[1], (B, T, D_IN), jnp.float32)
    x_audio = jax.random.normal(kx[2], (B, T, D_IN), jnp.float32)

    params, sub = init_params(k_p, D_IN, NUM_CLASSES)
    packed = pack_params(params, T, NUM_CLASSES)    # init-time parameter packing

    # TODO(synk): the text/video/audio sub-models are constructor arguments with no
    # definition in the spec; Linear(d_in -> 64) placeholders in plain JAX stand in.
    tex_out = jnp.dot(x_text, sub["wt"]) + sub["bt"]                     # (B, 64)
    vid_out = jnp.einsum("btd,df->btf", x_vid, sub["wv"]) + sub["bv"]    # (B, T, 64)
    aud_out = jnp.einsum("btd,df->btf", x_audio, sub["wa"]) + sub["ba"]  # (B, T, 64)

    out = combined_model_forward(tex_out, vid_out, aud_out, packed,
                                 num_classes=NUM_CLASSES)
    out = jax.block_until_ready(out)

    ref = reference_forward(tex_out, vid_out, aud_out, params)
    np.testing.assert_allclose(np.asarray(out), np.asarray(ref), rtol=1e-3, atol=1e-3)

    print("KERNEL_OK")
</pallas_src>

<mosaic_0001>
module attributes {stable_mosaic.version = 11 : i64} {
  func.func @_combined_kernel(%arg0: memref<2x1088xf32, #tpu.memory_space<vmem>>, %arg1: memref<1024x16xf32, #tpu.memory_space<vmem>>, %arg2: memref<4x192x192xf32, #tpu.memory_space<vmem>>, %arg3: memref<5x192xf32, #tpu.memory_space<vmem>>, %arg4: memref<2x4xf32, #tpu.memory_space<vmem>>) attributes {dimension_semantics = [], scalar_prefetch = 0 : i64, scratch_operands = 0 : i64, tpu.core_type = #tpu.core_type<tc>} {
    %c0 = arith.constant 0 : index
    %c0_0 = arith.constant 0 : index
    %0 = vector.load %arg0[%c0, %c0_0] : memref<2x1088xf32, #tpu.memory_space<vmem>>, vector<2x1088xf32>
    %c0_1 = arith.constant 0 : index
    %c0_2 = arith.constant 0 : index
    %1 = vector.load %arg3[%c0_1, %c0_2] : memref<5x192xf32, #tpu.memory_space<vmem>>, vector<5x192xf32>
    %2 = vector.extract_strided_slice %0 {offsets = [0, 0], sizes = [2, 1024], strides = [1, 1]} : vector<2x1088xf32> to vector<2x1024xf32>
    %c0_3 = arith.constant 0 : index
    %c0_4 = arith.constant 0 : index
    %3 = vector.load %arg1[%c0_3, %c0_4] : memref<1024x16xf32, #tpu.memory_space<vmem>>, vector<1024x16xf32>
    %cst = arith.constant dense<0.000000e+00> : vector<2x16xf32>
    %4 = tpu.matmul %2, %3, %cst {dimension_numbers = #tpu.dot_dimension_numbers<[1], [0], [0], [1], [0, 0, 1, 1], [], []>} : vector<2x1024xf32>, vector<1024x16xf32>, vector<2x16xf32> -> vector<2x16xf32>
    %5 = vector.extract_strided_slice %1 {offsets = [4, 0], sizes = [1, 16], strides = [1, 1]} : vector<5x192xf32> to vector<1x16xf32>
    %6 = vector.broadcast %5 : vector<1x16xf32> to vector<2x16xf32>
    %7 = arith.addf %4, %6 : vector<2x16xf32>
    %8 = vector.extract_strided_slice %7 {offsets = [0, 0], sizes = [2, 8], strides = [1, 1]} : vector<2x16xf32> to vector<2x8xf32>
    %cst_5 = arith.constant dense<0xFF800000> : vector<2xf32>
    %9 = vector.multi_reduction <maximumf>, %8, %cst_5 [1] : vector<2x8xf32> to vector<2xf32>
    %10 = vector.shape_cast %9 : vector<2xf32> to vector<2x1xf32>
    %11 = vector.broadcast %10 : vector<2x1xf32> to vector<2x8xf32>
    %12 = arith.subf %8, %11 : vector<2x8xf32>
    %13 = math.exp %12 : vector<2x8xf32>
    %14 = vector.extract_strided_slice %13 {offsets = [0, 0], sizes = [2, 1], strides = [1, 1]} : vector<2x8xf32> to vector<2x1xf32>
    %cst_6 = arith.constant dense<0.000000e+00> : vector<2xf32>
    %15 = vector.multi_reduction <add>, %13, %cst_6 [1] : vector<2x8xf32> to vector<2xf32>
    %16 = vector.shape_cast %15 : vector<2xf32> to vector<2x1xf32>
    %17 = arith.divf %14, %16 : vector<2x1xf32>
    %18 = vector.extract_strided_slice %7 {offsets = [0, 8], sizes = [2, 8], strides = [1, 1]} : vector<2x16xf32> to vector<2x8xf32>
    %cst_7 = arith.constant dense<0xFF800000> : vector<2xf32>
    %19 = vector.multi_reduction <maximumf>, %18, %cst_7 [1] : vector<2x8xf32> to vector<2xf32>
    %20 = vector.shape_cast %19 : vector<2xf32> to vector<2x1xf32>
    %21 = vector.broadcast %20 : vector<2x1xf32> to vector<2x8xf32>
    %22 = arith.subf %18, %21 : vector<2x8xf32>
    %23 = math.exp %22 : vector<2x8xf32>
    %24 = vector.extract_strided_slice %23 {offsets = [0, 0], sizes = [2, 1], strides = [1, 1]} : vector<2x8xf32> to vector<2x1xf32>
    %cst_8 = arith.constant dense<0.000000e+00> : vector<2xf32>
    %25 = vector.multi_reduction <add>, %23, %cst_8 [1] : vector<2x8xf32> to vector<2xf32>
    %26 = vector.shape_cast %25 : vector<2xf32> to vector<2x1xf32>
    %27 = arith.divf %24, %26 : vector<2x1xf32>
    %28 = vector.extract_strided_slice %0 {offsets = [0, 0], sizes = [2, 64], strides = [1, 1]} : vector<2x1088xf32> to vector<2x64xf32>
    %cst_9 = arith.constant 1.000000e+00 : f32
    %29 = vector.broadcast %cst_9 : f32 to vector<2x1xf32>
    %30 = arith.addf %29, %27 : vector<2x1xf32>
    %31 = vector.broadcast %30 : vector<2x1xf32> to vector<2x64xf32>
    %32 = arith.mulf %28, %31 : vector<2x64xf32>
    %33 = vector.extract_strided_slice %0 {offsets = [0, 512], sizes = [2, 64], strides = [1, 1]} : vector<2x1088xf32> to vector<2x64xf32>
    %cst_10 = arith.constant 1.000000e+00 : f32
    %34 = vector.broadcast %cst_10 : f32 to vector<2x1xf32>
    %35 = arith.addf %34, %17 : vector<2x1xf32>
    %36 = vector.broadcast %35 : vector<2x1xf32> to vector<2x64xf32>
    %37 = arith.mulf %33, %36 : vector<2x64xf32>
    %38 = vector.extract_strided_slice %0 {offsets = [0, 1024], sizes = [2, 64], strides = [1, 1]} : vector<2x1088xf32> to vector<2x64xf32>
    %39 = tpu.concatenate %38, %32, %37 in 1 : vector<2x64xf32>, vector<2x64xf32>, vector<2x64xf32> -> vector<2x192xf32>
    %c0_11 = arith.constant 0 : index
    %c0_12 = arith.constant 0 : index
    %c0_13 = arith.constant 0 : index
    %40 = vector.load %arg2[%c0_11, %c0_12, %c0_13] : memref<4x192x192xf32, #tpu.memory_space<vmem>>, vector<1x192x192xf32>
    %41 = vector.shape_cast %40 : vector<1x192x192xf32> to vector<192x192xf32>
    %cst_14 = arith.constant dense<0.000000e+00> : vector<2x192xf32>
    %42 = tpu.matmul %39, %41, %cst_14 {dimension_numbers = #tpu.dot_dimension_numbers<[1], [0], [0], [1], [0, 0, 1, 1], [], []>} : vector<2x192xf32>, vector<192x192xf32>, vector<2x192xf32> -> vector<2x192xf32>
    %43 = vector.extract_strided_slice %1 {offsets = [0, 0], sizes = [1, 192], strides = [1, 1]} : vector<5x192xf32> to vector<1x192xf32>
    %44 = vector.broadcast %43 : vector<1x192xf32> to vector<2x192xf32>
    %45 = arith.addf %42, %44 : vector<2x192xf32>
    %c1 = arith.constant 1 : index
    %c0_15 = arith.constant 0 : index
    %c0_16 = arith.constant 0 : index
    %46 = vector.load %arg2[%c1, %c0_15, %c0_16] : memref<4x192x192xf32, #tpu.memory_space<vmem>>, vector<1x192x192xf32>
    %47 = vector.shape_cast %46 : vector<1x192x192xf32> to vector<192x192xf32>
    %cst_17 = arith.constant dense<0.000000e+00> : vector<2x192xf32>
    %48 = tpu.matmul %45, %47, %cst_17 {dimension_numbers = #tpu.dot_dimension_numbers<[1], [0], [0], [1], [0, 0, 1, 1], [], []>} : vector<2x192xf32>, vector<192x192xf32>, vector<2x192xf32> -> vector<2x192xf32>
    %49 = vector.extract_strided_slice %1 {offsets = [1, 0], sizes = [1, 192], strides = [1, 1]} : vector<5x192xf32> to vector<1x192xf32>
    %50 = vector.broadcast %49 : vector<1x192xf32> to vector<2x192xf32>
    %51 = arith.addf %48, %50 : vector<2x192xf32>
    %c2 = arith.constant 2 : index
    %c0_18 = arith.constant 0 : index
    %c0_19 = arith.constant 0 : index
    %52 = vector.load %arg2[%c2, %c0_18, %c0_19] : memref<4x192x192xf32, #tpu.memory_space<vmem>>, vector<1x192x192xf32>
    %53 = vector.shape_cast %52 : vector<1x192x192xf32> to vector<192x192xf32>
    %cst_20 = arith.constant dense<0.000000e+00> : vector<2x192xf32>
    %54 = tpu.matmul %51, %53, %cst_20 {dimension_numbers = #tpu.dot_dimension_numbers<[1], [0], [0], [1], [0, 0, 1, 1], [], []>} : vector<2x192xf32>, vector<192x192xf32>, vector<2x192xf32> -> vector<2x192xf32>
    %55 = vector.extract_strided_slice %1 {offsets = [2, 0], sizes = [1, 192], strides = [1, 1]} : vector<5x192xf32> to vector<1x192xf32>
    %56 = vector.broadcast %55 : vector<1x192xf32> to vector<2x192xf32>
    %57 = arith.addf %54, %56 : vector<2x192xf32>
    %58 = arith.negf %57 : vector<2x192xf32>
    %59 = math.exp %58 : vector<2x192xf32>
    %cst_21 = arith.constant 1.000000e+00 : f32
    %60 = vector.broadcast %cst_21 : f32 to vector<2x192xf32>
    %61 = arith.addf %60, %59 : vector<2x192xf32>
    %62 = arith.divf %60, %61 : vector<2x192xf32>
    %63 = arith.mulf %51, %62 : vector<2x192xf32>
    %c3 = arith.constant 3 : index
    %c0_22 = arith.constant 0 : index
    %c0_23 = arith.constant 0 : index
    %64 = vector.load %arg2[%c3, %c0_22, %c0_23] : memref<4x192x192xf32, #tpu.memory_space<vmem>>, vector<1x192x192xf32>
    %65 = vector.shape_cast %64 : vector<1x192x192xf32> to vector<192x192xf32>
    %cst_24 = arith.constant dense<0.000000e+00> : vector<2x192xf32>
    %66 = tpu.matmul %63, %65, %cst_24 {dimension_numbers = #tpu.dot_dimension_numbers<[1], [0], [0], [1], [0, 0, 1, 1], [], []>} : vector<2x192xf32>, vector<192x192xf32>, vector<2x192xf32> -> vector<2x192xf32>
    %67 = vector.extract_strided_slice %66 {offsets = [0, 0], sizes = [2, 4], strides = [1, 1]} : vector<2x192xf32> to vector<2x4xf32>
    %68 = vector.extract_strided_slice %1 {offsets = [3, 0], sizes = [1, 4], strides = [1, 1]} : vector<5x192xf32> to vector<1x4xf32>
    %69 = vector.broadcast %68 : vector<1x4xf32> to vector<2x4xf32>
    %70 = arith.addf %67, %69 : vector<2x4xf32>
    %c0_25 = arith.constant 0 : index
    %c0_26 = arith.constant 0 : index
    %71 = vector.load %arg4[%c0_25, %c0_26] : memref<2x4xf32, #tpu.memory_space<vmem>>, vector<2x4xf32>
    tpu.vector_store %arg4[%c0_25, %c0_26], %70 {strides = array<i32>} : memref<2x4xf32, #tpu.memory_space<vmem>>, vector<2x4xf32>,
    return
  }
}

</mosaic_0001>

<bundles_post_ra>
// kernel: combined_model_forward.1
= control target key start
LH: loop header
LB: loop body
LE: loop exit
PB: predicated region body
PF: predicated region fallthrough
CT: control target
= control target key end

     0   :  { %9 = vsyncpa [#allocation3], 0  ;;  %s1811_s0 = inlined_call_operand.vmem [shape: f32[2,1088], index: 0, kind: input, shape index: {}]   ;;  %s1812_s1 = inlined_call_operand.vmem [shape: f32[1024,16], index: 1, kind: input, shape index: {}]   ;;  %s1813_s2 = inlined_call_operand.hbm [shape: f32[4,192,192], index: 2, kind: input, shape index: {}]   ;;  %s1814_s3 = inlined_call_operand.vmem [shape: f32[5,192], index: 3, kind: input, shape index: {}]   ;;  %s1815_s4 = inlined_call_operand.hbm [shape: f32[2,4], index: 4, kind: output, shape index: {}]  }
   0x1   :  { %10 = vsyncpa [#allocation4], 0  ;;  %s1317_s15 = smov [#allocation2]  }
   0x2   :  { %s20_s16 = sshll.u32 %s1317_s15, 4  ;;  %s21_s16 = int_to_ptr.vmem [resolvable:$true] %s20_s16 }
   0x3   :  { %s1281_s17 = scalar_lea.vmem %s21_s16, 24576  ;;  %p1286_p1 = scmp.lt.s32.totalorder %s21_s16, %s21_s16 }
   0x4   :  { %p1282_p0 = scmp.ne.s32.totalorder %s21_s16, %s1281_s17  ;;  %p1287_p2 = scmp.lt.s32.totalorder %s1281_s17, %s1281_s17 }
   0x6   :  { %p1288_p3 = por %p1287_p2, %p1286_p1 }
   0x8   :  { %p1289_p4 = pnand %p1288_p3, %p1282_p0 }
   0xa   :  { %1292 = shalt.err (!%p1289_p4)
}
   0xb   :  { %s1318_s18 = smov 256   ;;  %s1319_s19 = smov 16  }
   0xc   :  { %26 = dma.hbm_to_vmem [thread:$0]  %s1813_s2, 24576, %s21_s16, [#allocation3], %s1318_s18, %s1318_s18, %s1319_s19  }
   0xd   :  { %1313 = dma.done.wait [#allocation3], 24576  }
   0xe   :  { %1314 = vsyncadd [#allocation3], 4294942720  ;;  %v68_v0 = vld [vmem:[%s1812_s1 + $0xf8] sm:$0xff]  ;;  %v67_v4 = vld [vmem:[%s1812_s1 + $0xf0] sm:$0xff]  ;;  %v165_v30 = vlaneseq  ;;  %v1320_v31 = vmov 1983009808  }
   0xf   :  { %v100_v1 = vld [vmem:[%s1812_s1 + $0x1f8] sm:$0xff]  ;;  %1104 = vmatprep.subr.mxu0 %v68_v0  ;;  %v99_v5 = vld [vmem:[%s1812_s1 + $0x1f0] sm:$0xff]  ;;  %v66_v8 = vld [vmem:[%s1812_s1 + $0xe8] sm:$0xff]  ;;  %v173_v32 = vunpack.c.l.s4 %v1320_v31  ;;  %vm505_vm0 = vcmask 123968   ;;  %vm493_vm1 = vcmask 58368   ;;  %vm546_vm2 = vcmask 523264  }
  0x10   :  { %v52_v2 = vld [vmem:[%s1812_s1 + $0x78] sm:$0xff]  ;;  %1139 = vmatprep.subr.mxu1 %v100_v1  ;;  %v51_v6 = vld [vmem:[%s1812_s1 + $0x70] sm:$0xff]  ;;  %v98_v9 = vld [vmem:[%s1812_s1 + $0x1e8] sm:$0xff]  ;;  %v1468_v41 = vshrl.u32 %v165_v30, 7  ;;  %s1324_s14 = smov 64   ;;  %vm1081_vm3 = vcmask 25600  }
  0x11   :  { %v84_v3 = vld [vmem:[%s1812_s1 + $0x178] sm:$0xff]  ;;  %1105 = vmatpush3.msra.mxu0 %v52_v2  ;;  %v83_v7 = vld [vmem:[%s1812_s1 + $0x170] sm:$0xff]  ;;  %v50_v10 = vld [vmem:[%s1812_s1 + $0x68] sm:$0xff]  ;;  %v174_v42 = vunpack.c.0.s8 %v173_v32 }
  0x12   :  { %1140 = vmatpush3.msra.mxu1 %v84_v3  ;;  %1106 = vmatprep.subr.mxu0 %v67_v4  ;;  %v82_v11 = vld [vmem:[%s1812_s1 + $0x168] sm:$0xff]  ;;  %v65_v12 = vld [vmem:[%s1812_s1 + $0xe0] sm:$0xff]  ;;  %v64_v16 = vld [vmem:[%s1812_s1 + $0xd8] sm:$0xff] }
  0x13   :  { %1141 = vmatprep.subr.mxu1 %v99_v5  ;;  %1107 = vmatpush3.msra.mxu0 %v51_v6  ;;  %v97_v13 = vld [vmem:[%s1812_s1 + $0x1e0] sm:$0xff]  ;;  %v96_v17 = vld [vmem:[%s1812_s1 + $0x1d8] sm:$0xff]  ;;  %v63_v20 = vld [vmem:[%s1812_s1 + $0xd0] sm:$0xff]  ;;  %v1495_v51 = vsub.s32 %v174_v42, %v1468_v41 }
  0x14   :  { %1142 = vmatpush3.msra.mxu1 %v83_v7  ;;  %1108 = vmatprep.subr.mxu0 %v66_v8  ;;  %v49_v14 = vld [vmem:[%s1812_s1 + $0x60] sm:$0xff]  ;;  %v48_v18 = vld [vmem:[%s1812_s1 + $0x58] sm:$0xff]  ;;  %v95_v21 = vld [vmem:[%s1812_s1 + $0x1d0] sm:$0xff] }
  0x15   :  { %1143 = vmatprep.subr.mxu1 %v98_v9  ;;  %v81_v15 = vld [vmem:[%s1812_s1 + $0x160] sm:$0xff]  ;;  %1109 = vmatpush3.msra.mxu0 %v50_v10  ;;  %v80_v19 = vld [vmem:[%s1812_s1 + $0x158] sm:$0xff]  ;;  %v47_v22 = vld [vmem:[%s1812_s1 + $0x50] sm:$0xff] }
  0x16   :  { %1144 = vmatpush3.msra.mxu1 %v82_v11  ;;  %1110 = vmatprep.subr.mxu0 %v65_v12  ;;  %v79_v23 = vld [vmem:[%s1812_s1 + $0x150] sm:$0xff]  ;;  %v62_v24 = vld [vmem:[%s1812_s1 + $0xc8] sm:$0xff]  ;;  %v61_v28 = vld [vmem:[%s1812_s1 + $0xc0] sm:$0xff] }
  0x17   :  { %1145 = vmatprep.subr.mxu1 %v97_v13  ;;  %1111 = vmatpush3.msra.mxu0 %v49_v14  ;;  %v94_v25 = vld [vmem:[%s1812_s1 + $0x1c8] sm:$0xff]  ;;  %v93_v29 = vld [vmem:[%s1812_s1 + $0x1c0] sm:$0xff]  ;;  %v60_v35 = vld [vmem:[%s1812_s1 + $0xb8] sm:$0xff] }
  0x18   :  { %1146 = vmatpush3.msra.mxu1 %v81_v15  ;;  %1112 = vmatprep.subr.mxu0 %v64_v16  ;;  %v46_v26 = vld [vmem:[%s1812_s1 + $0x48] sm:$0xff]  ;;  %v45_v33 = vld [vmem:[%s1812_s1 + $0x40] sm:$0xff]  ;;  %v92_v36 = vld [vmem:[%s1812_s1 + $0x1b8] sm:$0xff] }
  0x19   :  { %1147 = vmatprep.subr.mxu1 %v96_v17  ;;  %1113 = vmatpush3.msra.mxu0 %v48_v18  ;;  %v78_v27 = vld [vmem:[%s1812_s1 + $0x148] sm:$0xff]  ;;  %v77_v34 = vld [vmem:[%s1812_s1 + $0x140] sm:$0xff]  ;;  %v44_v37 = vld [vmem:[%s1812_s1 + $0x38] sm:$0xff] }
  0x1a   :  { %1148 = vmatpush3.msra.mxu1 %v80_v19  ;;  %1114 = vmatprep.subr.mxu0 %v63_v20  ;;  %v76_v38 = vld [vmem:[%s1812_s1 + $0x138] sm:$0xff]  ;;  %v59_v39 = vld [vmem:[%s1812_s1 + $0xb0] sm:$0xff]  ;;  %v58_v45 = vld [vmem:[%s1812_s1 + $0xa8] sm:$0xff] }
  0x1b   :  { %1149 = vmatprep.subr.mxu1 %v95_v21  ;;  %1115 = vmatpush3.msra.mxu0 %v47_v22  ;;  %v91_v40 = vld [vmem:[%s1812_s1 + $0x1b0] sm:$0xff]  ;;  %v90_v46 = vld [vmem:[%s1812_s1 + $0x1a8] sm:$0xff]  ;;  %v57_v49 = vld [vmem:[%s1812_s1 + $0xa0] sm:$0xff] }
  0x1c   :  { %1150 = vmatpush3.msra.mxu1 %v79_v23  ;;  %1116 = vmatprep.subr.mxu0 %v62_v24  ;;  %v43_v43 = vld [vmem:[%s1812_s1 + $0x30] sm:$0xff]  ;;  %v42_v47 = vld [vmem:[%s1812_s1 + $0x28] sm:$0xff]  ;;  %v89_v50 = vld [vmem:[%s1812_s1 + $0x1a0] sm:$0xff] }
  0x1d   :  { %1151 = vmatprep.subr.mxu1 %v94_v25  ;;  %1117 = vmatpush3.msra.mxu0 %v46_v26  ;;  %v75_v44 = vld [vmem:[%s1812_s1 + $0x130] sm:$0xff]  ;;  %v74_v48 = vld [vmem:[%s1812_s1 + $0x128] sm:$0xff]  ;;  %v41_v52 = vld [vmem:[%s1812_s1 + $0x20] sm:$0xff] }
  0x1e   :  { %1152 = vmatpush3.msra.mxu1 %v78_v27  ;;  %1118 = vmatprep.subr.mxu0 %v61_v28  ;;  %v73_v53 = vld [vmem:[%s1812_s1 + $0x120] sm:$0xff]  ;;  %v56_v55 = vld [vmem:[%s1812_s1 + $0x98] sm:$0xff]  ;;  %v55_v60 = vld [vmem:[%s1812_s1 + $0x90] sm:$0xff] }
  0x1f   :  { %1153 = vmatprep.subr.mxu1 %v93_v29  ;;  %1119 = vmatpush3.msra.mxu0 %v45_v33  ;;  %v1506_v54 = vld [vmem:[%s1811_s0] sm:$0xff]  ;;  %v88_v56 = vld [vmem:[%s1812_s1 + $0x198] sm:$0xff]  ;;  %v87_v61 = vld [vmem:[%s1812_s1 + $0x190] sm:$0xff] }
  0x20   :  { %1154 = vmatpush3.msra.mxu1 %v77_v34  ;;  %1120 = vmatprep.subr.mxu0 %v60_v35  ;;  %v171_v57 = vcombine.high %v1506_v54, %v1506_v54  ;;  %v40_v58 = vld [vmem:[%s1812_s1 + $0x18] sm:$0xff]  ;;  %v178_v62 = vrot.slane %v1506_v54, %v1495_v51  ;;  %v39_v63 = vld [vmem:[%s1812_s1 + $0x10] sm:$0xff]  ;;  %v54_v1 = vld [vmem:[%s1812_s1 + $0x88] sm:$0xff] }
  0x21   :  { %1155 = vmatprep.subr.mxu1 %v92_v36  ;;  %1121 = vmatpush3.msra.mxu0 %v44_v37  ;;  %v72_v59 = vld [vmem:[%s1812_s1 + $0x118] sm:$0xff]  ;;  %v71_v0 = vld [vmem:[%s1812_s1 + $0x110] sm:$0xff]  ;;  %v86_v2 = vld [vmem:[%s1812_s1 + $0x188] sm:$0xff] }
  0x22   :  { %1156 = vmatpush3.msra.mxu1 %v76_v38  ;;  %1122 = vmatprep.subr.mxu0 %v59_v39  ;;  %v185_v3 = vrot.slane %v171_v57, %v1495_v51  ;;  %v38_v4 = vld [vmem:[%s1812_s1 + $0x8] sm:$0xff]  ;;  %v53_v6 = vld [vmem:[%s1812_s1 + $0x80] sm:$0xff]  ;;  %v186_v8 = vcombine.high %v178_v62, %v178_v62  ;;  %v132_v12 = vld [vmem:[%s1812_s1 + $0x2f8] sm:$0xff] }
  0x23   :  { %1157 = vmatprep.subr.mxu1 %v91_v40  ;;  %1123 = vmatpush3.msra.mxu0 %v43_v43  ;;  %v70_v5 = vld [vmem:[%s1812_s1 + $0x108] sm:$0xff]  ;;  %v85_v7 = vld [vmem:[%s1812_s1 + $0x180] sm:$0xff]  ;;  %v164_v13 = vld [vmem:[%s1812_s1 + $0x3f8] sm:$0xff] }
  0x24   :  { %1158 = vmatpush3.msra.mxu1 %v75_v44  ;;  %1124 = vmatprep.subr.mxu0 %v58_v45  ;;  %v37_v9 = vld [vmem:[%s1812_s1] sm:$0xff]  ;;  %v187_v11 = vcombine.high %v185_v3, %v185_v3  ;;  %v116_v14 = vld [vmem:[%s1812_s1 + $0x278] sm:$0xff]  ;;  %v131_v16 = vld [vmem:[%s1812_s1 + $0x2f0] sm:$0xff] }
  0x25   :  { %1159 = vmatprep.subr.mxu1 %v90_v46  ;;  %1125 = vmatpush3.msra.mxu0 %v42_v47  ;;  %v69_v10 = vld [vmem:[%s1812_s1 + $0x100] sm:$0xff]  ;;  %v148_v15 = vld [vmem:[%s1812_s1 + $0x378] sm:$0xff]  ;;  %v163_v17 = vld [vmem:[%s1812_s1 + $0x3f0] sm:$0xff] }
  0x26   :  { %1160 = vmatpush3.msra.mxu1 %v74_v48  ;;  %1126 = vmatprep.subr.mxu0 %v57_v49  ;;  %v115_v18 = vld [vmem:[%s1812_s1 + $0x270] sm:$0xff]  ;;  %v130_v20 = vld [vmem:[%s1812_s1 + $0x2e8] sm:$0xff]  ;;  %v129_v24 = vld [vmem:[%s1812_s1 + $0x2e0] sm:$0xff] }
  0x27   :  { %1161 = vmatprep.subr.mxu1 %v89_v50  ;;  %1127 = vmatpush3.msra.mxu0 %v41_v52  ;;  %v147_v19 = vld [vmem:[%s1812_s1 + $0x370] sm:$0xff]  ;;  %v162_v21 = vld [vmem:[%s1812_s1 + $0x3e8] sm:$0xff]  ;;  %v161_v25 = vld [vmem:[%s1812_s1 + $0x3e0] sm:$0xff] }
  0x28   :  { %1162 = vmatpush3.msra.mxu1 %v73_v53  ;;  %1128 = vmatprep.subr.mxu0 %v56_v55  ;;  %v114_v22 = vld [vmem:[%s1812_s1 + $0x268] sm:$0xff]  ;;  %v113_v26 = vld [vmem:[%s1812_s1 + $0x260] sm:$0xff]  ;;  %v128_v28 = vld [vmem:[%s1812_s1 + $0x2d8] sm:$0xff] }
  0x29   :  { %1163 = vmatprep.subr.mxu1 %v88_v56  ;;  %1129 = vmatpush3.msra.mxu0 %v40_v58  ;;  %v146_v23 = vld [vmem:[%s1812_s1 + $0x368] sm:$0xff]  ;;  %v145_v27 = vld [vmem:[%s1812_s1 + $0x360] sm:$0xff]  ;;  %v160_v29 = vld [vmem:[%s1812_s1 + $0x3d8] sm:$0xff] }
  0x2a   :  { %1164 = vmatpush3.msra.mxu1 %v72_v59  ;;  %1130 = vmatprep.subr.mxu0 %v55_v60  ;;  %v112_v30 = vld [vmem:[%s1812_s1 + $0x258] sm:$0xff]  ;;  %v127_v32 = vld [vmem:[%s1812_s1 + $0x2d0] sm:$0xff]  ;;  %v126_v36 = vld [vmem:[%s1812_s1 + $0x2c8] sm:$0xff] }
  0x2b   :  { %1165 = vmatprep.subr.mxu1 %v87_v61  ;;  %1131 = vmatpush3.msra.mxu0 %v39_v63  ;;  %v144_v31 = vld [vmem:[%s1812_s1 + $0x358] sm:$0xff]  ;;  %v159_v33 = vld [vmem:[%s1812_s1 + $0x3d0] sm:$0xff]  ;;  %v158_v37 = vld [vmem:[%s1812_s1 + $0x3c8] sm:$0xff] }
  0x2c   :  { %1166 = vmatpush3.msra.mxu1 %v71_v0  ;;  %1132 = vmatprep.subr.mxu0 %v54_v1  ;;  %v111_v34 = vld [vmem:[%s1812_s1 + $0x250] sm:$0xff]  ;;  %v110_v38 = vld [vmem:[%s1812_s1 + $0x248] sm:$0xff]  ;;  %v125_v40 = vld [vmem:[%s1812_s1 + $0x2c0] sm:$0xff] }
  0x2d   :  { %1167 = vmatprep.subr.mxu1 %v86_v2  ;;  %1133 = vmatpush3.msra.mxu0 %v38_v4  ;;  %v143_v35 = vld [vmem:[%s1812_s1 + $0x350] sm:$0xff]  ;;  %v142_v39 = vld [vmem:[%s1812_s1 + $0x348] sm:$0xff]  ;;  %v157_v42 = vld [vmem:[%s1812_s1 + $0x3c0] sm:$0xff] }
  0x2e   :  { %1168 = vmatpush3.msra.mxu1 %v70_v5  ;;  %1134 = vmatprep.subr.mxu0 %v53_v6  ;;  %v109_v43 = vld [vmem:[%s1812_s1 + $0x240] sm:$0xff]  ;;  %v124_v45 = vld [vmem:[%s1812_s1 + $0x2b8] sm:$0xff]  ;;  %v123_v49 = vld [vmem:[%s1812_s1 + $0x2b0] sm:$0xff] }
  0x2f   :  { %1169 = vmatprep.subr.mxu1 %v85_v7  ;;  %1135 = vmatpush3.msra.mxu0 %v37_v9  ;;  %v141_v44 = vld [vmem:[%s1812_s1 + $0x340] sm:$0xff]  ;;  %v156_v46 = vld [vmem:[%s1812_s1 + $0x3b8] sm:$0xff]  ;;  %v155_v50 = vld [vmem:[%s1812_s1 + $0x3b0] sm:$0xff] }
  0x30   :  { %277 = vmatprep.mubr.f32.mxu0 %v186_v8  ;;  %1170 = vmatpush3.msra.mxu1 %v69_v10  ;;  %v108_v47 = vld [vmem:[%s1812_s1 + $0x238] sm:$0xff]  ;;  %v107_v52 = vld [vmem:[%s1812_s1 + $0x230] sm:$0xff]  ;;  %v122_v55 = vld [vmem:[%s1812_s1 + $0x2a8] sm:$0xff] }
  0x31   :  { %278 = vmatmul.mubr.f32.vlgmr.msra.gmra.mxu0 %v178_v62  ;;  %347 = vmatprep.mubr.f32.mxu1 %v187_v11  ;;  %v140_v48 = vld [vmem:[%s1812_s1 + $0x338] sm:$0xff]  ;;  %v139_v53 = vld [vmem:[%s1812_s1 + $0x330] sm:$0xff]  ;;  %v154_v56 = vld [vmem:[%s1812_s1 + $0x3a8] sm:$0xff] }
  0x32   :  { %1174 = vmatprep.subr.mxu0 %v132_v12  ;;  %1209 = vmatprep.subr.mxu1 %v164_v13  ;;  %v1690_v57 = vld [vmem:[%s1811_s0 + $0x8] sm:$0xff]  ;;  %v121_v60 = vld [vmem:[%s1812_s1 + $0x2a0] sm:$0xff]  ;;  %v120_v1 = vld [vmem:[%s1812_s1 + $0x298] sm:$0xff] }
  0x33   :  { %348 = vmatmul.mubr.f32.vlgmr.msra.gmra.mxu1 %v185_v3  ;;  %1175 = vmatpush3.msra.mxu0 %v116_v14  ;;  %v106_v58 = vld [vmem:[%s1812_s1 + $0x228] sm:$0xff]  ;;  %v153_v61 = vld [vmem:[%s1812_s1 + $0x3a0] sm:$0xff]  ;;  %v188_v0 = vcombine.high %v1690_v57, %v1690_v57  ;;  %v152_v2 = vld [vmem:[%s1812_s1 + $0x398] sm:$0xff]  ;;  %v195_v7 = vrot.slane %v1690_v57, %v1495_v51 }
  0x34   :  { %1210 = vmatpush3.msra.mxu1 %v148_v15  ;;  %1176 = vmatprep.subr.mxu0 %v131_v16  ;;  %v138_v59 = vld [vmem:[%s1812_s1 + $0x328] sm:$0xff]  ;;  %v105_v62 = vld [vmem:[%s1812_s1 + $0x220] sm:$0xff]  ;;  %v104_v3 = vld [vmem:[%s1812_s1 + $0x218] sm:$0xff] }
  0x35   :  { %1211 = vmatprep.subr.mxu1 %v163_v17  ;;  %1177 = vmatpush3.msra.mxu0 %v115_v18  ;;  %v137_v63 = vld [vmem:[%s1812_s1 + $0x320] sm:$0xff]  ;;  %v136_v4 = vld [vmem:[%s1812_s1 + $0x318] sm:$0xff]  ;;  %v119_v5 = vld [vmem:[%s1812_s1 + $0x290] sm:$0xff]  ;;  %v202_v10 = vrot.slane %v188_v0, %v1495_v51  ;;  %v203_v17 = vcombine.high %v195_v7, %v195_v7 }
  0x36   :  { %1212 = vmatpush3.msra.mxu1 %v147_v19  ;;  %1178 = vmatprep.subr.mxu0 %v130_v20  ;;  %v151_v6 = vld [vmem:[%s1812_s1 + $0x390] sm:$0xff]  ;;  %v118_v11 = vld [vmem:[%s1812_s1 + $0x288] sm:$0xff]  ;;  %v117_v15 = vld [vmem:[%s1812_s1 + $0x280] sm:$0xff] }
  0x37   :  { %1213 = vmatprep.subr.mxu1 %v162_v21  ;;  %1179 = vmatpush3.msra.mxu0 %v114_v22  ;;  %v103_v8 = vld [vmem:[%s1812_s1 + $0x210] sm:$0xff]  ;;  %v150_v12 = vld [vmem:[%s1812_s1 + $0x388] sm:$0xff]  ;;  %v149_v16 = vld [vmem:[%s1812_s1 + $0x380] sm:$0xff]  ;;  %v204_v19 = vcombine.high %v202_v10, %v202_v10  ;;  %v167_v22 = vsub.s32 4, %v1468_v41 }
  0x38   :  { %1214 = vmatpush3.msra.mxu1 %v146_v23  ;;  %1180 = vmatprep.subr.mxu0 %v129_v24  ;;  %v135_v9 = vld [vmem:[%s1812_s1 + $0x310] sm:$0xff]  ;;  %v102_v13 = vld [vmem:[%s1812_s1 + $0x208] sm:$0xff]  ;;  %v101_v18 = vld [vmem:[%s1812_s1 + $0x200] sm:$0xff] }
  0x39   :  { %1215 = vmatprep.subr.mxu1 %v161_v25  ;;  %1181 = vmatpush3.msra.mxu0 %v113_v26  ;;  %v134_v14 = vld [vmem:[%s1812_s1 + $0x308] sm:$0xff]  ;;  %v133_v20 = vld [vmem:[%s1812_s1 + $0x300] sm:$0xff]  ;;  %s1321_s1 = smov 120  }
  0x3a   :  { %1216 = vmatpush3.msra.mxu1 %v145_v27  ;;  %1182 = vmatprep.subr.mxu0 %v128_v28  ;;  %v1767_v24 = vld [vmem:[%s1814_s3] sm:$0x1f] }
  0x3b   :  { %1217 = vmatprep.subr.mxu1 %v160_v29  ;;  %1183 = vmatpush3.msra.mxu0 %v112_v30  ;;  %v168_v26 = vrot.slane %v1767_v24, %v167_v22  ;;  %v560_v22 = vld [vmem:[#allocation2 + $0x60] sm:$0xff] }
  0x3c   :  { %1218 = vmatpush3.msra.mxu1 %v144_v31  ;;  %1184 = vmatprep.subr.mxu0 %v127_v32 }
  0x3d   :  { %1219 = vmatprep.subr.mxu1 %v159_v33  ;;  %1185 = vmatpush3.msra.mxu0 %v111_v34 }
  0x3e   :  { %1220 = vmatpush3.msra.mxu1 %v143_v35  ;;  %1186 = vmatprep.subr.mxu0 %v126_v36 }
  0x3f   :  { %1221 = vmatprep.subr.mxu1 %v158_v37  ;;  %1187 = vmatpush3.msra.mxu0 %v110_v38 }
  0x40   :  { %1222 = vmatpush3.msra.mxu1 %v142_v39  ;;  %1188 = vmatprep.subr.mxu0 %v125_v40 }
  0x41   :  { %1223 = vmatprep.subr.mxu1 %v157_v42  ;;  %1189 = vmatpush3.msra.mxu0 %v109_v43 }
  0x42   :  { %1224 = vmatpush3.msra.mxu1 %v141_v44  ;;  %1190 = vmatprep.subr.mxu0 %v124_v45 }
  0x43   :  { %1225 = vmatprep.subr.mxu1 %v156_v46  ;;  %1191 = vmatpush3.msra.mxu0 %v108_v47 }
  0x44   :  { %1226 = vmatpush3.msra.mxu1 %v140_v48  ;;  %1192 = vmatprep.subr.mxu0 %v123_v49 }
  0x45   :  { %1227 = vmatprep.subr.mxu1 %v155_v50  ;;  %1193 = vmatpush3.msra.mxu0 %v107_v52 }
  0x46   :  { %1228 = vmatpush3.msra.mxu1 %v139_v53  ;;  %1194 = vmatprep.subr.mxu0 %v122_v55 }
  0x47   :  { %1229 = vmatprep.subr.mxu1 %v154_v56  ;;  %1195 = vmatpush3.msra.mxu0 %v106_v58  ;;  %v1322_v56 = vmov 8   ;;  %v1323_v58 = vmov 0  }
  0x48   :  { %1230 = vmatpush3.msra.mxu1 %v138_v59  ;;  %1196 = vmatprep.subr.mxu0 %v121_v60 }
  0x49   :  { %1231 = vmatprep.subr.mxu1 %v153_v61  ;;  %1197 = vmatpush3.msra.mxu0 %v105_v62 }
  0x4a   :  { %1232 = vmatpush3.msra.mxu1 %v137_v63  ;;  %1198 = vmatprep.subr.mxu0 %v120_v1 }
  0x4b   :  { %1233 = vmatprep.subr.mxu1 %v152_v2  ;;  %1199 = vmatpush3.msra.mxu0 %v104_v3  ;;  %v579_v3 = vld [vmem:[#allocation2 + $0xf8] sm:$0xff] }
  0x4c   :  { %1234 = vmatpush3.msra.mxu1 %v136_v4  ;;  %1200 = vmatprep.subr.mxu0 %v119_v5  ;;  %v578_v4 = vld [vmem:[#allocation2 + $0xf0] sm:$0xff]  ;;  %v577_v5 = vld [vmem:[#allocation2 + $0xe8] sm:$0xff] }
  0x4d   :  { %1235 = vmatprep.subr.mxu1 %v151_v6  ;;  %1201 = vmatpush3.msra.mxu0 %v103_v8  ;;  %v576_v6 = vld [vmem:[#allocation2 + $0xe0] sm:$0xff]  ;;  %v574_v8 = vld [vmem:[#allocation2 + $0xd0] sm:$0xff] }
  0x4e   :  { %1236 = vmatpush3.msra.mxu1 %v135_v9  ;;  %1202 = vmatprep.subr.mxu0 %v118_v11  ;;  %v573_v9 = vld [vmem:[#allocation2 + $0xc8] sm:$0xff]  ;;  %v571_v11 = vld [vmem:[#allocation2 + $0xb8] sm:$0xff] }
  0x4f   :  { %1237 = vmatprep.subr.mxu1 %v150_v12  ;;  %1203 = vmatpush3.msra.mxu0 %v102_v13  ;;  %v570_v12 = vld [vmem:[#allocation2 + $0xb0] sm:$0xff]  ;;  %v569_v13 = vld [vmem:[#allocation2 + $0xa8] sm:$0xff] }
  0x50   :  { %1238 = vmatpush3.msra.mxu1 %v134_v14  ;;  %1204 = vmatprep.subr.mxu0 %v117_v15  ;;  %v568_v14 = vld [vmem:[#allocation2 + $0xa0] sm:$0xff]  ;;  %v567_v15 = vld [vmem:[#allocation2 + $0x98] sm:$0xff] }
  0x51   :  { %1239 = vmatprep.subr.mxu1 %v149_v16  ;;  %1205 = vmatpush3.msra.mxu0 %v101_v18  ;;  %v566_v16 = vld [vmem:[#allocation2 + $0x90] sm:$0xff]  ;;  %v564_v18 = vld [vmem:[#allocation2 + $0x80] sm:$0xff] }
  0x52   :  { %417 = vmatprep.mubr.f32.mxu0 %v203_v17  ;;  %1240 = vmatpush3.msra.mxu1 %v133_v20  ;;  %v565_v17 = vld [vmem:[#allocation2 + $0x88] sm:$0xff]  ;;  %v562_v20 = vld [vmem:[#allocation2 + $0x70] sm:$0xff] }
  0x53   :  { %487 = vmatprep.mubr.f32.mxu1 %v204_v19  ;;  %418 = vmatmul.mubr.f32.vlgmr.msra.gmra.mxu0 %v195_v7  ;;  %v575_v7 = vld [vmem:[#allocation2 + $0xd8] sm:$0xff] }
  0x54   :  { %488 = vmatmul.mubr.f32.vlgmr.msra.gmra.mxu1 %v202_v10  ;;  %1253 = vset.pattern.permute.xlu1 %v1322_v56  ;;  %v572_v10 = vld [vmem:[#allocation2 + $0xc0] sm:$0xff]  ;;  %v563_v19 = vld [vmem:[#allocation2 + $0x78] sm:$0xff]  ;;  %v709_v56 = vld [vmem:[#allocation2 + $0x270] sm:$0xff] }
  0x55   :  { %1254 = vset.pattern.permute.xlu0 %v1323_v58  ;;  %607 = vmatprep.subr.mxu0 %v579_v3  ;;  %v708_v58 = vld [vmem:[#allocation2 + $0x268] sm:$0xff] }
  0x56   :  { %608 = vmatpush1.msra.mxu0 %v578_v4  ;;  %v700_v4 = vld [vmem:[#allocation2 + $0x228] sm:$0xff] }
  0x57   :  { %609 = vmatprep.subr.mxu0 %v577_v5  ;;  %v699_v5 = vld [vmem:[#allocation2 + $0x220] sm:$0xff] }
  0x58   :  { %610 = vmatpush1.msra.mxu0 %v576_v6 }
  0x59   :  { %611 = vmatprep.subr.mxu0 %v575_v7  ;;  %v698_v7 = vld [vmem:[#allocation2 + $0x218] sm:$0xff] }
  0x5a   :  { %612 = vmatpush1.msra.mxu0 %v574_v8 }
  0x5b   :  { %613 = vmatprep.subr.mxu0 %v573_v9  ;;  %v697_v9 = vld [vmem:[#allocation2 + $0x210] sm:$0xff] }
  0x5c   :  { %614 = vmatpush1.msra.mxu0 %v572_v10 }
  0x5d   :  { %615 = vmatprep.subr.mxu0 %v571_v11  ;;  %v696_v11 = vld [vmem:[#allocation2 + $0x208] sm:$0xff] }
  0x5e   :  { %616 = vmatpush1.msra.mxu0 %v570_v12  ;;  %v694_v12 = vld [vmem:[#allocation2 + $0x1f8] sm:$0xff] }
  0x5f   :  { %617 = vmatprep.subr.mxu0 %v569_v13  ;;  %v692_v13 = vld [vmem:[#allocation2 + $0x1e8] sm:$0xff] }
  0x60   :  { %618 = vmatpush1.msra.mxu0 %v568_v14  ;;  %v691_v14 = vld [vmem:[#allocation2 + $0x1e0] sm:$0xff] }
  0x61   :  { %619 = vmatprep.subr.mxu0 %v567_v15  ;;  %v690_v15 = vld [vmem:[#allocation2 + $0x1d8] sm:$0xff] }
  0x62   :  { %620 = vmatpush1.msra.mxu0 %v566_v16  ;;  %v688_v16 = vld [vmem:[#allocation2 + $0x1c8] sm:$0xff] }
  0x63   :  { %621 = vmatprep.subr.mxu0 %v565_v17  ;;  %v687_v17 = vld [vmem:[#allocation2 + $0x1c0] sm:$0xff] }
  0x64   :  { %622 = vmatpush1.msra.mxu0 %v564_v18  ;;  %v686_v18 = vld [vmem:[#allocation2 + $0x1b8] sm:$0xff] }
  0x65   :  { %623 = vmatprep.subr.mxu0 %v563_v19  ;;  %v685_v19 = vld [vmem:[#allocation2 + $0x1b0] sm:$0xff] }
  0x66   :  { %624 = vmatpush1.msra.mxu0 %v562_v20  ;;  %v684_v20 = vld [vmem:[#allocation2 + $0x1a8] sm:$0xff] }
  0xf1   :  { %v1136_v21 = vpop.f32.mrf.mxu0 }
  0xf3   :  { %v1171_v23 = vpop.f32.mrf.mxu1  ;;  %v1137_v25 = vpop.f32.mrf.mxu0 }
  0xf4   :  { %v1138_v27 = vadd.f32 %v1137_v25, %v1136_v21  ;;  %v561_v21 = vld [vmem:[#allocation2 + $0x68] sm:$0xff]  ;;  %v558_v25 = vld [vmem:[#allocation2 + $0x50] sm:$0xff] }
  0xf5   :  { %v1172_v28 = vpop.f32.mrf.mxu1  ;;  %625 = vmatprep.subr.mxu0 %v561_v21  ;;  %v683_v21 = vld [vmem:[#allocation2 + $0x1a0] sm:$0xff] }
  0xf6   :  { %v280_v29 = vadd.f32 %v1138_v27, %v168_v26  ;;  %v1173_v30 = vadd.f32 %v1172_v28, %v1171_v23  ;;  %v559_v23 = vld [vmem:[#allocation2 + $0x58] sm:$0xff]  ;;  %626 = vmatpush1.msra.mxu0 %v560_v22  ;;  %v557_v26 = vld [vmem:[#allocation2 + $0x48] sm:$0xff]  ;;  %v556_v27 = vld [vmem:[#allocation2 + $0x40] sm:$0xff] }
  0xf7   :  { %627 = vmatprep.subr.mxu0 %v559_v23  ;;  %v555_v28 = vld [vmem:[#allocation2 + $0x38] sm:$0xff]  ;;  %v681_v23 = vld [vmem:[#allocation2 + $0x190] sm:$0xff] }
  0xf8   :  { %v350_v35 = vadd.f32 %v1173_v30, %v280_v29  ;;  %628 = vmatpush1.msra.mxu0 %v558_v25  ;;  %v554_v29 = vld [vmem:[#allocation2 + $0x30] sm:$0xff]  ;;  %v553_v30 = vld [vmem:[#allocation2 + $0x28] sm:$0xff]  ;;  %v682_v22 = vld [vmem:[#allocation2 + $0x198] sm:$0xff] }
  0xf9   :  { %629 = vmatprep.subr.mxu0 %v557_v26  ;;  %v680_v25 = vld [vmem:[#allocation2 + $0x188] sm:$0xff]  ;;  %v679_v26 = vld [vmem:[#allocation2 + $0x180] sm:$0xff] }
  0xfa   :  { %630 = vmatpush1.msra.mxu0 %v556_v27  ;;  %v726_v27 = vld [vmem:[#allocation2 + $0x2f8] sm:$0xff] }
  0xfb   :  { %631 = vmatprep.subr.mxu0 %v555_v28  ;;  %v725_v28 = vld [vmem:[#allocation2 + $0x2f0] sm:$0xff] }
  0xfc   :  { %632 = vmatpush1.msra.mxu0 %v554_v29  ;;  %v724_v29 = vld [vmem:[#allocation2 + $0x2e8] sm:$0xff] }
  0xfd   :  { %633 = vmatprep.subr.mxu0 %v553_v30  ;;  %v723_v30 = vld [vmem:[#allocation2 + $0x2e0] sm:$0xff] }
 0x113   :  { %v1206_v31 = vpop.f32.mrf.mxu0 }
 0x114   :  { %v1241_v32 = vpop.f32.mrf.mxu1 }
 0x115   :  { %v1207_v33 = vpop.f32.mrf.mxu0 }
 0x116   :  { %v1242_v34 = vpop.f32.mrf.mxu1  ;;  %v1208_v36 = vadd.f32 %v1207_v33, %v1206_v31  ;;  %v552_v31 = vld [vmem:[#allocation2 + $0x20] sm:$0xff]  ;;  %v550_v33 = vld [vmem:[#allocation2 + $0x10] sm:$0xff] }
 0x117   :  { %v1243_v38 = vadd.f32 %v1242_v34, %v1241_v32  ;;  %v551_v32 = vld [vmem:[#allocation2 + $0x18] sm:$0xff]  ;;  %634 = vmatpush1.msra.mxu0 %v552_v31  ;;  %v549_v34 = vld [vmem:[#allocation2 + $0x8] sm:$0xff] }
 0x118   :  { %v420_v37 = vadd.f32 %v1208_v36, %v350_v35  ;;  %635 = vmatprep.subr.mxu0 %v551_v32  ;;  %v548_v35 = vld [vmem:[#allocation2] sm:$0xff]  ;;  %v595_v36 = vld [vmem:[#allocation2 + $0x178] sm:$0xff]  ;;  %v721_v32 = vld [vmem:[#allocation2 + $0x2d0] sm:$0xff] }
 0x119   :  { %636 = vmatpush1.msra.mxu0 %v550_v33  ;;  %v722_v31 = vld [vmem:[#allocation2 + $0x2d8] sm:$0xff]  ;;  %v720_v33 = vld [vmem:[#allocation2 + $0x2c8] sm:$0xff] }
 0x11a   :  { %v490_v39 = vadd.f32 %v1243_v38, %v420_v37  ;;  %637 = vmatprep.subr.mxu0 %v549_v34  ;;  %v594_v37 = vld [vmem:[#allocation2 + $0x170] sm:$0xff]  ;;  %v593_v38 = vld [vmem:[#allocation2 + $0x168] sm:$0xff]  ;;  %v719_v34 = vld [vmem:[#allocation2 + $0x2c0] sm:$0xff] }
 0x11b   :  { %638 = vmatpush1.msra.mxu0 %v548_v35  ;;  %v718_v35 = vld [vmem:[#allocation2 + $0x2b8] sm:$0xff] }
 0x11c   :  { %v506_v40 = vsel %vm505_vm0, %v490_v39, -inf  ;;  %v494_v42 = vsel %vm493_vm1, %v490_v39, -inf  ;;  %655 = vmatprep.subr.mxu0 %v595_v36  ;;  %v717_v36 = vld [vmem:[#allocation2 + $0x2b0] sm:$0xff] }
 0x11d   :  { %507 = vmax.xlane.f32.xlu0 %v506_v40  ;;  %495 = vmax.xlane.f32.xlu1 %v494_v42  ;;  %v591_v40 = vld [vmem:[#allocation2 + $0x158] sm:$0xff]  ;;  %v590_v42 = vld [vmem:[#allocation2 + $0x150] sm:$0xff] }
 0x11e   :  { %656 = vmatpush2.msra.mxu0 %v594_v37  ;;  %v34_v37 = vld [vmem:[%s1811_s0 + $0x10] sm:$0x3] }
 0x11f   :  { %657 = vmatprep.subr.mxu0 %v593_v38 }
 0x1a6   :  { %v508_v43 = vpop.xlane.xlu0 %507  ;;  %v496_v47 = vpop.xlane.xlu1 %495 }
 0x1a7   :  { %v509_v44 = vsub.f32 %v490_v39, %v508_v43  ;;  %v497_v48 = vsub.f32 %v490_v39, %v496_v47  ;;  %v592_v39 = vld [vmem:[#allocation2 + $0x160] sm:$0xff]  ;;  %v589_v43 = vld [vmem:[#allocation2 + $0x148] sm:$0xff] }
 0x1a8   :  { %658 = vmatpush2.msra.mxu0 %v592_v39  ;;  %v585_v47 = vld [vmem:[#allocation2 + $0x128] sm:$0xff] }
 0x1a9   :  { %v510_v45 = vmul.f32 1.442695, %v509_v44  ;;  %v498_v49 = vmul.f32 1.442695, %v497_v48  ;;  %659 = vmatprep.subr.mxu0 %v591_v40  ;;  %v588_v44 = vld [vmem:[#allocation2 + $0x140] sm:$0xff]  ;;  %v716_v40 = vld [vmem:[#allocation2 + $0x2a8] sm:$0xff] }
 0x1aa   :  { %660 = vmatpush2.msra.mxu0 %v590_v42  ;;  %v584_v48 = vld [vmem:[#allocation2 + $0x120] sm:$0xff] }
 0x1ab   :  { %1257 = vpow2.f32 %v510_v45  ;;  %v587_v45 = vld [vmem:[#allocation2 + $0x138] sm:$0xff]  ;;  %661 = vmatprep.subr.mxu0 %v589_v43  ;;  %v715_v42 = vld [vmem:[#allocation2 + $0x2a0] sm:$0xff] }
 0x1ac   :  { %1259 = vpow2.f32 %v498_v49  ;;  %662 = vmatpush2.msra.mxu0 %v588_v44  ;;  %v583_v49 = vld [vmem:[#allocation2 + $0x118] sm:$0xff]  ;;  %v713_v44 = vld [vmem:[#allocation2 + $0x290] sm:$0xff] }
 0x1ad   :  { %663 = vmatprep.subr.mxu0 %v587_v45  ;;  %v714_v43 = vld [vmem:[#allocation2 + $0x298] sm:$0xff]  ;;  %v712_v45 = vld [vmem:[#allocation2 + $0x288] sm:$0xff] }
 0x1b8   :  { %v1258_v46 = vpop.eup %1257 }
 0x1b9   :  { %513 = vrot.lane.b32.xlu0 %v1258_v46, %s1321_s1  ;;  %v1260_v53 = vpop.eup %1259 }
 0x1ba   :  { %v500_v55 = vsel %vm493_vm1, %v1260_v53, 0.0 }
 0x22b   :  { %v514_v50 = vpop.permute.xlu0 %513 }
 0x22c   :  { %v516_v52 = vsel %vm493_vm1, %v514_v50, 0.0  ;;  %v582_v50 = vld [vmem:[#allocation2 + $0x110] sm:$0xff] }
 0x22d   :  { %517 = vadd.xlane.f32.xlu1 %v516_v52  ;;  %v581_v52 = vld [vmem:[#allocation2 + $0x108] sm:$0xff] }
 0x231   :  { %501 = vadd.xlane.f32.xlu1 %v500_v55  ;;  %v710_v55 = vld [vmem:[#allocation2 + $0x278] sm:$0xff] }
 0x232   :  { %738 = vmatprep.subr.mxu1 %v710_v55  ;;  %v835_v55 = vld [vmem:[#allocation2 + $0x3c8] sm:$0xff] }
 0x233   :  { %739 = vmatpush1.msra.mxu1 %v709_v56  ;;  %v834_v56 = vld [vmem:[#allocation2 + $0x3c0] sm:$0xff] }
 0x234   :  { %740 = vmatprep.subr.mxu1 %v708_v58  ;;  %v833_v58 = vld [vmem:[#allocation2 + $0x3b8] sm:$0xff] }
 0x2b6   :  { %v518_v59 = vpop.xlane.xlu1 %517 }
 0x2b7   :  { %1261 = vrcp.f32 %v518_v59  ;;  %v707_v59 = vld [vmem:[#allocation2 + $0x260] sm:$0xff] }
 0x2b8   :  { %741 = vmatpush1.msra.mxu1 %v707_v59  ;;  %v832_v59 = vld [vmem:[#allocation2 + $0x3b0] sm:$0xff] }
 0x2ba   :  { %v502_v60 = vpop.xlane.xlu1 %501 }
 0x2bb   :  { %1263 = vrcp.f32 %v502_v60  ;;  %v706_v60 = vld [vmem:[#allocation2 + $0x258] sm:$0xff] }
 0x2bc   :  { %742 = vmatprep.subr.mxu1 %v706_v60  ;;  %v831_v60 = vld [vmem:[#allocation2 + $0x3a8] sm:$0xff] }
 0x2c4   :  { %v1262_v61 = vpop.eup %1261 }
 0x2c5   :  { %v520_v62 = vmul.f32 %v1262_v61, %v1258_v46  ;;  %v586_v46 = vld [vmem:[#allocation2 + $0x130] sm:$0xff] }
 0x2c6   :  { %664 = vmatpush2.msra.mxu0 %v586_v46  ;;  %v705_v61 = vld [vmem:[#allocation2 + $0x250] sm:$0xff]  ;;  %v711_v46 = vld [vmem:[#allocation2 + $0x280] sm:$0xff] }
 0x2c7   :  { %v521_v63 = vadd.f32 1.0, %v520_v62  ;;  %665 = vmatprep.subr.mxu0 %v585_v47  ;;  %v704_v62 = vld [vmem:[#allocation2 + $0x248] sm:$0xff]  ;;  %743 = vmatpush1.msra.mxu1 %v705_v61  ;;  %v841_v47 = vld [vmem:[#allocation2 + $0x3f8] sm:$0xff]  ;;  %v830_v61 = vld [vmem:[#allocation2 + $0x3a0] sm:$0xff] }
 0x2c8   :  { %v1264_v0 = vpop.eup %1263  ;;  %666 = vmatpush2.msra.mxu0 %v584_v48  ;;  %744 = vmatprep.subr.mxu1 %v704_v62  ;;  %v840_v48 = vld [vmem:[#allocation2 + $0x3f0] sm:$0xff]  ;;  %v829_v62 = vld [vmem:[#allocation2 + $0x398] sm:$0xff] }
 0x2c9   :  { %524 = vperm.xlu1 %1253, %v521_v63   ;;  %v504_v1 = vmul.f32 %v1264_v0, %v1260_v53  ;;  %667 = vmatprep.subr.mxu0 %v583_v49  ;;  %v580_v53 = vld [vmem:[#allocation2 + $0x100] sm:$0xff]  ;;  %v702_v0 = vld [vmem:[#allocation2 + $0x238] sm:$0xff]  ;;  %v839_v49 = vld [vmem:[#allocation2 + $0x3e8] sm:$0xff] }
 0x2ca   :  { %668 = vmatpush2.msra.mxu0 %v582_v50  ;;  %v703_v63 = vld [vmem:[#allocation2 + $0x240] sm:$0xff] }
 0x2cb   :  { %v528_v2 = vadd.f32 1.0, %v504_v1  ;;  %669 = vmatprep.subr.mxu0 %v581_v52  ;;  %745 = vmatpush1.msra.mxu1 %v703_v63  ;;  %v838_v50 = vld [vmem:[#allocation2 + $0x3e0] sm:$0xff]  ;;  %v837_v52 = vld [vmem:[#allocation2 + $0x3d8] sm:$0xff]  ;;  %v828_v63 = vld [vmem:[#allocation2 + $0x390] sm:$0xff] }
 0x2cc   :  { %670 = vmatpush2.msra.mxu0 %v580_v53  ;;  %746 = vmatprep.subr.mxu1 %v702_v0  ;;  %v836_v53 = vld [vmem:[#allocation2 + $0x3d0] sm:$0xff]  ;;  %v827_v0 = vld [vmem:[#allocation2 + $0x388] sm:$0xff] }
 0x2cd   :  { %531 = vperm.xlu0 %1254, %v528_v2   ;;  %v701_v2 = vld [vmem:[#allocation2 + $0x230] sm:$0xff]  ;;  %869 = vmatprep.subr.mxu0 %v841_v47  ;;  %v980_v47 = vld [vmem:[#allocation2 + $0x548] sm:$0xff] }
 0x2ce   :  { %747 = vmatpush1.msra.mxu1 %v701_v2  ;;  %v825_v2 = vld [vmem:[#allocation2 + $0x378] sm:$0xff] }
 0x2cf   :  { %748 = vmatprep.subr.mxu1 %v700_v4  ;;  %v823_v4 = vld [vmem:[#allocation2 + $0x368] sm:$0xff] }
 0x2d0   :  { %749 = vmatpush1.msra.mxu1 %v699_v5  ;;  %v822_v5 = vld [vmem:[#allocation2 + $0x360] sm:$0xff] }
 0x2d1   :  { %750 = vmatprep.subr.mxu1 %v698_v7  ;;  %v820_v7 = vld [vmem:[#allocation2 + $0x350] sm:$0xff] }
 0x2d2   :  { %751 = vmatpush1.msra.mxu1 %v697_v9  ;;  %v818_v9 = vld [vmem:[#allocation2 + $0x340] sm:$0xff] }
 0x2d3   :  { %752 = vmatprep.subr.mxu1 %v696_v11  ;;  %v816_v11 = vld [vmem:[#allocation2 + $0x330] sm:$0xff] }
 0x344   :  { %v525_v1 = vpop.permute.xlu1 %524 }
 0x345   :  { %v527_v3 = vmul.f32 %v525_v1, %v1506_v54  ;;  %v695_v54 = vld [vmem:[#allocation2 + $0x200] sm:$0xff] }
 0x346   :  { %753 = vmatpush1.msra.mxu1 %v695_v54  ;;  %v826_v1 = vld [vmem:[#allocation2 + $0x380] sm:$0xff]  ;;  %v815_v54 = vld [vmem:[#allocation2 + $0x328] sm:$0xff] }
 0x347   :  { %v542_v6 = vrot.slane %v527_v3, %v1495_v51  ;;  %v693_v51 = vld [vmem:[#allocation2 + $0x1f0] sm:$0xff]  ;;  %754 = vmatprep.subr.mxu1 %v694_v12  ;;  %v814_v12 = vld [vmem:[#allocation2 + $0x320] sm:$0xff] }
 0x348   :  { %v532_v8 = vpop.permute.xlu0 %531  ;;  %755 = vmatpush1.msra.mxu1 %v693_v51  ;;  %v824_v3 = vld [vmem:[#allocation2 + $0x370] sm:$0xff]  ;;  %v813_v51 = vld [vmem:[#allocation2 + $0x318] sm:$0xff] }
 0x349   :  { %v534_v10 = vmul.f32 %v532_v8, %v1690_v57  ;;  %543 = vrot.lane.b32.xlu1 %v542_v6, %s1324_s14  ;;  %756 = vmatprep.subr.mxu1 %v692_v13  ;;  %v689_v57 = vld [vmem:[#allocation2 + $0x1d0] sm:$0xff]  ;;  %v821_v6 = vld [vmem:[#allocation2 + $0x358] sm:$0xff]  ;;  %v819_v8 = vld [vmem:[#allocation2 + $0x348] sm:$0xff] }
 0x34a   :  { %757 = vmatpush1.msra.mxu1 %v691_v14  ;;  %v812_v13 = vld [vmem:[#allocation2 + $0x310] sm:$0xff]  ;;  %v811_v14 = vld [vmem:[#allocation2 + $0x308] sm:$0xff] }
 0x34b   :  { %1098 = vmatprep.mubr.msk.f32.mxu0 %vm546_vm2, %v534_v10  ;;  %758 = vmatprep.subr.mxu1 %v690_v15  ;;  %v817_v10 = vld [vmem:[#allocation2 + $0x338] sm:$0xff]  ;;  %v810_v15 = vld [vmem:[#allocation2 + $0x300] sm:$0xff] }
 0x34c   :  { %759 = vmatpush1.msra.mxu1 %v689_v57  ;;  %v857_v57 = vld [vmem:[#allocation2 + $0x478] sm:$0xff] }
 0x34d   :  { %760 = vmatprep.subr.mxu1 %v688_v16  ;;  %v856_v16 = vld [vmem:[#allocation2 + $0x470] sm:$0xff] }
 0x34e   :  { %761 = vmatpush1.msra.mxu1 %v687_v17  ;;  %v855_v17 = vld [vmem:[#allocation2 + $0x468] sm:$0xff] }
 0x34f   :  { %762 = vmatprep.subr.mxu1 %v686_v18  ;;  %v854_v18 = vld [vmem:[#allocation2 + $0x460] sm:$0xff] }
 0x350   :  { %763 = vmatpush1.msra.mxu1 %v685_v19  ;;  %v853_v19 = vld [vmem:[#allocation2 + $0x458] sm:$0xff] }
 0x351   :  { %764 = vmatprep.subr.mxu1 %v684_v20  ;;  %v852_v20 = vld [vmem:[#allocation2 + $0x450] sm:$0xff] }
 0x352   :  { %765 = vmatpush1.msra.mxu1 %v683_v21  ;;  %v851_v21 = vld [vmem:[#allocation2 + $0x448] sm:$0xff] }
 0x353   :  { %766 = vmatprep.subr.mxu1 %v682_v22  ;;  %v850_v22 = vld [vmem:[#allocation2 + $0x440] sm:$0xff] }
 0x354   :  { %767 = vmatpush1.msra.mxu1 %v681_v23  ;;  %v849_v23 = vld [vmem:[#allocation2 + $0x438] sm:$0xff] }
 0x355   :  { %768 = vmatprep.subr.mxu1 %v680_v25  ;;  %v848_v25 = vld [vmem:[#allocation2 + $0x430] sm:$0xff] }
 0x356   :  { %769 = vmatpush1.msra.mxu1 %v679_v26  ;;  %v598_v26 = vsub.s32 0, %v1468_v41 }
 0x357   :  { %786 = vmatprep.subr.mxu1 %v726_v27  ;;  %v1785_v27 = vld [vmem:[%s1814_s3 + $0x8] sm:$0x1f]  ;;  %s1325_s3 = smov [#allocation5]  }
 0x358   :  { %787 = vmatpush2.msra.mxu1 %v725_v28  ;;  %v603_v28 = vrot.slane %v1785_v27, %v598_v26  ;;  %s1089_s18 = sshll.u32 %s1325_s3, 4  ;;  %s1090_s18 = int_to_ptr.vmem [resolvable:$true] %s1089_s18 }
 0x359   :  { %788 = vmatprep.subr.mxu1 %v724_v29  ;;  %v599_v29 = vrot.slane %v1767_v24, %v598_v26  ;;  %v993_v26 = vld [vmem:[#allocation2 + $0x5b0] sm:$0xff]  ;;  %s1293_s19 = scalar_lea.vmem %s1090_s18, 32  ;;  %p1298_p6 = scmp.lt.s32.totalorder %s1090_s18, %s1090_s18 }
 0x35a   :  { %789 = vmatpush2.msra.mxu1 %v723_v30  ;;  %p1294_p5 = scmp.ne.s32.totalorder %s1090_s18, %s1293_s19  ;;  %p1299_p7 = scmp.lt.s32.totalorder %s1293_s19, %s1293_s19 }
 0x35b   :  { %790 = vmatprep.subr.mxu1 %v722_v31 }
 0x35c   :  { %791 = vmatpush2.msra.mxu1 %v721_v32  ;;  %p1300_p8 = por %p1299_p7, %p1298_p6 }
 0x35d   :  { %792 = vmatprep.subr.mxu1 %v720_v33 }
 0x35e   :  { %793 = vmatpush2.msra.mxu1 %v719_v34  ;;  %v847_v34 = vld [vmem:[#allocation2 + $0x428] sm:$0xff]  ;;  %p1301_p9 = pnand %p1300_p8, %p1294_p5 }
 0x35f   :  { %794 = vmatprep.subr.mxu1 %v718_v35  ;;  %v846_v35 = vld [vmem:[#allocation2 + $0x420] sm:$0xff] }
 0x360   :  { %795 = vmatpush2.msra.mxu1 %v717_v36  ;;  %v845_v36 = vld [vmem:[#allocation2 + $0x418] sm:$0xff] }
 0x361   :  { %796 = vmatprep.subr.mxu1 %v716_v40  ;;  %v986_v40 = vld [vmem:[#allocation2 + $0x578] sm:$0xff] }
 0x362   :  { %797 = vmatpush2.msra.mxu1 %v715_v42  ;;  %v985_v42 = vld [vmem:[#allocation2 + $0x570] sm:$0xff] }
 0x363   :  { %798 = vmatprep.subr.mxu1 %v714_v43  ;;  %v984_v43 = vld [vmem:[#allocation2 + $0x568] sm:$0xff] }
 0x364   :  { %799 = vmatpush2.msra.mxu1 %v713_v44  ;;  %v983_v44 = vld [vmem:[#allocation2 + $0x560] sm:$0xff] }
 0x365   :  { %800 = vmatprep.subr.mxu1 %v712_v45  ;;  %v982_v45 = vld [vmem:[#allocation2 + $0x558] sm:$0xff] }
 0x366   :  { %801 = vmatpush2.msra.mxu1 %v711_v46  ;;  %v981_v46 = vld [vmem:[#allocation2 + $0x550] sm:$0xff] }
 0x367   :  { %1006 = vmatprep.subr.mxu1 %v986_v40 }
 0x3bb   :  { %v544_v38 = vpop.permute.xlu1 %543 }
 0x3bc   :  { %v547_v39 = vsel %vm546_vm2, %v34_v37, %v544_v38  ;;  %v844_v37 = vld [vmem:[#allocation2 + $0x410] sm:$0xff]  ;;  %v843_v38 = vld [vmem:[#allocation2 + $0x408] sm:$0xff] }
 0x3bd   :  { %672 = vmatmul.mubr.f32.vlgmr.msra.gmra.mxu0 %v547_v39  ;;  %v842_v39 = vld [vmem:[#allocation2 + $0x400] sm:$0xff] }
 0x3be   :  { %870 = vmatpush1.msra.mxu0 %v840_v48  ;;  %v979_v48 = vld [vmem:[#allocation2 + $0x540] sm:$0xff] }
 0x3bf   :  { %871 = vmatprep.subr.mxu0 %v839_v49  ;;  %v729_v49 = vsub.s32 1, %v1468_v41 }
 0x3c0   :  { %872 = vmatpush1.msra.mxu0 %v838_v50 }
 0x3c1   :  { %873 = vmatprep.subr.mxu0 %v837_v52  ;;  %v734_v50 = vrot.slane %v1785_v27, %v729_v49  ;;  %v730_v52 = vrot.slane %v1767_v24, %v729_v49 }
 0x3c2   :  { %874 = vmatpush1.msra.mxu0 %v836_v53 }
 0x3c3   :  { %875 = vmatprep.subr.mxu0 %v835_v55 }
 0x3c4   :  { %876 = vmatpush1.msra.mxu0 %v834_v56 }
 0x3c5   :  { %877 = vmatprep.subr.mxu0 %v833_v58 }
 0x3c6   :  { %878 = vmatpush1.msra.mxu0 %v832_v59  ;;  %v978_v59 = vld [vmem:[#allocation2 + $0x538] sm:$0xff] }
 0x3c7   :  { %879 = vmatprep.subr.mxu0 %v831_v60  ;;  %v977_v60 = vld [vmem:[#allocation2 + $0x530] sm:$0xff] }
 0x3c8   :  { %880 = vmatpush1.msra.mxu0 %v830_v61  ;;  %v976_v61 = vld [vmem:[#allocation2 + $0x528] sm:$0xff] }
 0x3c9   :  { %881 = vmatprep.subr.mxu0 %v829_v62  ;;  %v975_v62 = vld [vmem:[#allocation2 + $0x520] sm:$0xff] }
 0x3ca   :  { %882 = vmatpush1.msra.mxu0 %v828_v63  ;;  %v974_v63 = vld [vmem:[#allocation2 + $0x518] sm:$0xff] }
 0x3cb   :  { %883 = vmatprep.subr.mxu0 %v827_v0  ;;  %v973_v0 = vld [vmem:[#allocation2 + $0x510] sm:$0xff] }
 0x3cc   :  { %884 = vmatpush1.msra.mxu0 %v826_v1  ;;  %v972_v1 = vld [vmem:[#allocation2 + $0x508] sm:$0xff] }
 0x3cd   :  { %885 = vmatprep.subr.mxu0 %v825_v2  ;;  %v971_v2 = vld [vmem:[#allocation2 + $0x500] sm:$0xff] }
 0x3ce   :  { %886 = vmatpush1.msra.mxu0 %v824_v3  ;;  %v970_v3 = vld [vmem:[#allocation2 + $0x4f8] sm:$0xff] }
 0x3cf   :  { %887 = vmatprep.subr.mxu0 %v823_v4  ;;  %v969_v4 = vld [vmem:[#allocation2 + $0x4f0] sm:$0xff] }
 0x3d0   :  { %888 = vmatpush1.msra.mxu0 %v822_v5  ;;  %v968_v5 = vld [vmem:[#allocation2 + $0x4e8] sm:$0xff] }
 0x3d1   :  { %889 = vmatprep.subr.mxu0 %v821_v6  ;;  %v967_v6 = vld [vmem:[#allocation2 + $0x4e0] sm:$0xff] }
 0x3d2   :  { %890 = vmatpush1.msra.mxu0 %v820_v7  ;;  %v966_v7 = vld [vmem:[#allocation2 + $0x4d8] sm:$0xff] }
 0x3d3   :  { %891 = vmatprep.subr.mxu0 %v819_v8  ;;  %v965_v8 = vld [vmem:[#allocation2 + $0x4d0] sm:$0xff] }
 0x3d4   :  { %892 = vmatpush1.msra.mxu0 %v818_v9  ;;  %v964_v9 = vld [vmem:[#allocation2 + $0x4c8] sm:$0xff] }
 0x3d5   :  { %893 = vmatprep.subr.mxu0 %v817_v10  ;;  %v963_v10 = vld [vmem:[#allocation2 + $0x4c0] sm:$0xff] }
 0x3d6   :  { %894 = vmatpush1.msra.mxu0 %v816_v11  ;;  %v962_v11 = vld [vmem:[#allocation2 + $0x4b8] sm:$0xff] }
 0x3d7   :  { %895 = vmatprep.subr.mxu0 %v815_v54  ;;  %v961_v54 = vld [vmem:[#allocation2 + $0x4b0] sm:$0xff] }
 0x3d8   :  { %896 = vmatpush1.msra.mxu0 %v814_v12  ;;  %v960_v12 = vld [vmem:[#allocation2 + $0x4a8] sm:$0xff] }
 0x3d9   :  { %897 = vmatprep.subr.mxu0 %v813_v51  ;;  %v959_v51 = vld [vmem:[#allocation2 + $0x4a0] sm:$0xff] }
 0x3da   :  { %898 = vmatpush1.msra.mxu0 %v812_v13  ;;  %v958_v13 = vld [vmem:[#allocation2 + $0x498] sm:$0xff] }
 0x3db   :  { %899 = vmatprep.subr.mxu0 %v811_v14  ;;  %v957_v14 = vld [vmem:[#allocation2 + $0x490] sm:$0xff] }
 0x3dc   :  { %900 = vmatpush1.msra.mxu0 %v810_v15  ;;  %v956_v15 = vld [vmem:[#allocation2 + $0x488] sm:$0xff] }
 0x3dd   :  { %917 = vmatprep.subr.mxu0 %v857_v57  ;;  %v955_v57 = vld [vmem:[#allocation2 + $0x480] sm:$0xff] }
 0x3de   :  { %918 = vmatpush2.msra.mxu0 %v856_v16  ;;  %v1002_v16 = vld [vmem:[#allocation2 + $0x5f8] sm:$0xff] }
 0x3df   :  { %919 = vmatprep.subr.mxu0 %v855_v17  ;;  %v1001_v17 = vld [vmem:[#allocation2 + $0x5f0] sm:$0xff] }
 0x3e0   :  { %920 = vmatpush2.msra.mxu0 %v854_v18  ;;  %v1000_v18 = vld [vmem:[#allocation2 + $0x5e8] sm:$0xff] }
 0x3e1   :  { %921 = vmatprep.subr.mxu0 %v853_v19  ;;  %v999_v19 = vld [vmem:[#allocation2 + $0x5e0] sm:$0xff] }
 0x3e2   :  { %922 = vmatpush2.msra.mxu0 %v852_v20  ;;  %v998_v20 = vld [vmem:[#allocation2 + $0x5d8] sm:$0xff] }
 0x3e3   :  { %923 = vmatprep.subr.mxu0 %v851_v21  ;;  %v997_v21 = vld [vmem:[#allocation2 + $0x5d0] sm:$0xff] }
 0x3e4   :  { %924 = vmatpush2.msra.mxu0 %v850_v22  ;;  %v996_v22 = vld [vmem:[#allocation2 + $0x5c8] sm:$0xff] }
 0x3e5   :  { %925 = vmatprep.subr.mxu0 %v849_v23  ;;  %v995_v23 = vld [vmem:[#allocation2 + $0x5c0] sm:$0xff] }
 0x3e6   :  { %926 = vmatpush2.msra.mxu0 %v848_v25  ;;  %v994_v25 = vld [vmem:[#allocation2 + $0x5b8] sm:$0xff] }
 0x3e7   :  { %927 = vmatprep.subr.mxu0 %v847_v34  ;;  %v860_v34 = vsub.s32 2, %v1468_v41 }
 0x3e8   :  { %928 = vmatpush2.msra.mxu0 %v846_v35 }
 0x3e9   :  { %929 = vmatprep.subr.mxu0 %v845_v36  ;;  %v861_v35 = vrot.slane %v1767_v24, %v860_v34  ;;  %v865_v36 = vrot.slane %v1785_v27, %v860_v34 }
 0x3ea   :  { %930 = vmatpush2.msra.mxu0 %v844_v37 }
 0x3eb   :  { %931 = vmatprep.subr.mxu0 %v843_v38 }
 0x3ec   :  { %932 = vmatpush2.msra.mxu0 %v842_v39 }
 0x47d   :  { %v673_v30 = vpop.f32.mrf.mxu0 }
 0x47e   :  { %v674_v33 = vadd.f32 %v673_v30, %v599_v29  ;;  %v991_v29 = vld [vmem:[#allocation2 + $0x5a0] sm:$0xff]  ;;  %v990_v30 = vld [vmem:[#allocation2 + $0x598] sm:$0xff] }
 0x47f   :  { %v675_v31 = vpop.f32.mrf.mxu0 }
 0x480   :  { %v676_v32 = vadd.f32 %v675_v31, %v603_v28  ;;  %v992_v28 = vld [vmem:[#allocation2 + $0x5a8] sm:$0xff]  ;;  %v989_v31 = vld [vmem:[#allocation2 + $0x590] sm:$0xff] }
 0x482   :  { %1099 = vmatprep.mubr.msk.f32.mxu1 %vm546_vm2, %v676_v32  ;;  %v988_v32 = vld [vmem:[#allocation2 + $0x588] sm:$0xff] }
 0x483   :  { %803 = vmatmul.mubr.f32.vlgmr.msra.gmra.mxu1 %v674_v33  ;;  %v987_v33 = vld [vmem:[#allocation2 + $0x580] sm:$0xff] }
 0x484   :  { %1007 = vmatpush1.msra.mxu1 %v985_v42 }
 0x485   :  { %1008 = vmatprep.subr.mxu1 %v984_v43 }
 0x486   :  { %1009 = vmatpush1.msra.mxu1 %v983_v44 }
 0x487   :  { %1010 = vmatprep.subr.mxu1 %v982_v45 }
 0x488   :  { %1011 = vmatpush1.msra.mxu1 %v981_v46 }
 0x489   :  { %1012 = vmatprep.subr.mxu1 %v980_v47 }
 0x48a   :  { %1013 = vmatpush1.msra.mxu1 %v979_v48 }
 0x48b   :  { %1014 = vmatprep.subr.mxu1 %v978_v59 }
 0x48c   :  { %1015 = vmatpush1.msra.mxu1 %v977_v60 }
 0x48d   :  { %1016 = vmatprep.subr.mxu1 %v976_v61 }
 0x48e   :  { %1017 = vmatpush1.msra.mxu1 %v975_v62 }
 0x48f   :  { %1018 = vmatprep.subr.mxu1 %v974_v63 }
 0x490   :  { %1019 = vmatpush1.msra.mxu1 %v973_v0 }
 0x491   :  { %1020 = vmatprep.subr.mxu1 %v972_v1 }
 0x492   :  { %1021 = vmatpush1.msra.mxu1 %v971_v2 }
 0x493   :  { %1022 = vmatprep.subr.mxu1 %v970_v3 }
 0x494   :  { %1023 = vmatpush1.msra.mxu1 %v969_v4 }
 0x495   :  { %1024 = vmatprep.subr.mxu1 %v968_v5 }
 0x496   :  { %1025 = vmatpush1.msra.mxu1 %v967_v6 }
 0x497   :  { %1026 = vmatprep.subr.mxu1 %v966_v7 }
 0x498   :  { %1027 = vmatpush1.msra.mxu1 %v965_v8 }
 0x499   :  { %1028 = vmatprep.subr.mxu1 %v964_v9 }
 0x49a   :  { %1029 = vmatpush1.msra.mxu1 %v963_v10 }
 0x49b   :  { %1030 = vmatprep.subr.mxu1 %v962_v11 }
 0x49c   :  { %1031 = vmatpush1.msra.mxu1 %v961_v54 }
 0x49d   :  { %1032 = vmatprep.subr.mxu1 %v960_v12 }
 0x49e   :  { %1033 = vmatpush1.msra.mxu1 %v959_v51 }
 0x49f   :  { %1034 = vmatprep.subr.mxu1 %v958_v13 }
 0x4a0   :  { %1035 = vmatpush1.msra.mxu1 %v957_v14 }
 0x4a1   :  { %1036 = vmatprep.subr.mxu1 %v956_v15 }
 0x4a2   :  { %1037 = vmatpush1.msra.mxu1 %v955_v57 }
 0x4a3   :  { %1054 = vmatprep.subr.mxu1 %v1002_v16 }
 0x4a4   :  { %1055 = vmatpush2.msra.mxu1 %v1001_v17 }
 0x4a5   :  { %1056 = vmatprep.subr.mxu1 %v1000_v18 }
 0x4a6   :  { %1057 = vmatpush2.msra.mxu1 %v999_v19 }
 0x4a7   :  { %1058 = vmatprep.subr.mxu1 %v998_v20 }
 0x4a8   :  { %1059 = vmatpush2.msra.mxu1 %v997_v21 }
 0x4a9   :  { %1060 = vmatprep.subr.mxu1 %v996_v22 }
 0x4aa   :  { %1061 = vmatpush2.msra.mxu1 %v995_v23 }
 0x4ab   :  { %1062 = vmatprep.subr.mxu1 %v994_v25 }
 0x4ac   :  { %1063 = vmatpush2.msra.mxu1 %v993_v26 }
 0x4ad   :  { %1064 = vmatprep.subr.mxu1 %v992_v28 }
 0x4ae   :  { %1065 = vmatpush2.msra.mxu1 %v991_v29 }
 0x4af   :  { %1066 = vmatprep.subr.mxu1 %v990_v30 }
 0x4b0   :  { %1067 = vmatpush2.msra.mxu1 %v989_v31 }
 0x4b1   :  { %1068 = vmatprep.subr.mxu1 %v988_v32 }
 0x4b2   :  { %1069 = vmatpush2.msra.mxu1 %v987_v33 }
 0x543   :  { %v804_v53 = vpop.f32.mrf.mxu1 }
 0x544   :  { %v1795_v58 = vadd.f32 %v804_v53, %v730_v52  ;;  %v1078_v52 = vsub.s32 3, %v1468_v41 }
 0x545   :  { %v806_v55 = vpop.f32.mrf.mxu1 }
 0x546   :  { %v1793_v56 = vadd.f32 %v806_v55, %v734_v50  ;;  %v1079_v53 = vrot.slane %v1767_v24, %v1078_v52 }
 0x548   :  { %1100 = vmatprep.mubr.msk.f32.mxu0 %vm546_vm2, %v1793_v56 }
 0x549   :  { %934 = vmatmul.mubr.f32.vlgmr.msra.gmra.mxu0 %v1795_v58 }
 0x609   :  { %v935_v37 = vpop.f32.mrf.mxu0 }
 0x60a   :  { %v936_v38 = vadd.f32 %v935_v37, %v861_v35 }
 0x60b   :  { %v937_v39 = vpop.f32.mrf.mxu0 }
 0x60c   :  { %v1101_v40 = vmul.f32 -1.442695, %v936_v38  ;;  %v938_v42 = vadd.f32 %v937_v39, %v865_v36 }
 0x60e   :  { %1265 = vpow2.f32 %v1101_v40  ;;  %v1102_v43 = vmul.f32 -1.442695, %v938_v42 }
 0x610   :  { %1267 = vpow2.f32 %v1102_v43 }
 0x61b   :  { %v1266_v44 = vpop.eup %1265 }
 0x61c   :  { %v946_v45 = vadd.f32 1.0, %v1266_v44 }
 0x61d   :  { %v1268_v46 = vpop.eup %1267 }
 0x61e   :  { %v947_v47 = vadd.f32 1.0, %v1268_v46  ;;  %1269 = vrcp.f32 %v946_v45 }
 0x620   :  { %1271 = vrcp.f32 %v947_v47 }
 0x62b   :  { %v1270_v48 = vpop.eup %1269 }
 0x62c   :  { %v952_v27 = vmul.f32 %v1270_v48, %v1795_v58 }
 0x62d   :  { %v1272_v49 = vpop.eup %1271 }
 0x62e   :  { %v953_v50 = vmul.f32 %v1272_v49, %v1793_v56 }
 0x630   :  { %1103 = vmatprep.mubr.msk.f32.mxu1 %vm546_vm2, %v953_v50 }
 0x631   :  { %1071 = vmatmul.mubr.f32.vlgmr.msra.gmra.mxu1 %v952_v27 }
 0x6f1   :  { %v1072_v55 = vpop.f32.mrf.mxu1 }
 0x6f2   :  { %v1080_v59 = vadd.f32 %v1079_v53, %v1072_v55 }
 0x6f3   :  { %v1074_v60 = vpop.f32.mrf.mxu1 }
 0x6f4   :  { %1082 = vst.msk [vmem:[#allocation5] sm:$0x3] %vm1081_vm3, %v1080_v59 }
 0x6f5   :  { %1304 = shalt.err (!%p1301_p9)
}
 0x6f6   :  { %1092 = dma.vmem_to_hbm [thread:$0]  %s1090_s18, 32, %s1815_s4, [#allocation4]  }
 0x6f7   :  { %1315 = dma.done.wait [#allocation4], 32  }
 0x6f8   :  { %1316 = vsyncadd [#allocation4], 4294967264 }
 0x6f9   :  { %1096 = vsyncpa [#allocation3], 1 }
 0x6fa   :  { %1097 = vsyncpa [#allocation4], 1 }

</bundles_post_ra>
